<compile_context>
chip_gen: v6e
topology: v6e:2x2x1
jax: 0.10.0
libtpu: 0.0.40
codegen_flags: <defaults>
</compile_context>

<pallas_src>
import functools

import jax
import jax.numpy as jnp
from jax.experimental import pallas as pl
from jax.experimental.pallas import tpu as pltpu


def outconv_kernel(x_ref, w_ref, b_ref, o_ref):
    """One grid step of the 1x1 conv.

    x_ref: (Cin, TS)    spatial tile of one batch element (lane-dense)
    w_ref: (Cout, Cin)  conv weight
    b_ref: (Cout, 1)    conv bias (broadcast over lanes)
    o_ref: (Cout, TS)   output tile (lane-dense)
    """
    y = jnp.dot(w_ref[...], x_ref[...], preferred_element_type=jnp.float32)
    y = y + b_ref[...].astype(jnp.float32)
    o_ref[...] = y.astype(o_ref.dtype)


def _round_up(x, m):
    return ((x + m - 1) // m) * m


def _pick_spatial_tile(hw, cin, cout, itemsize,
                       *, vmem_budget_bytes=12 * 1024 * 1024, max_tile=32768):
    """Channel-aware lane tile.

    Per-step pipelined VMEM footprint ~= (2*Cin + 2*Cout) * ts * itemsize
    (x and out are double-buffered; weight/bias are single-buffered and tiny).
    Keep that under ~12 MiB so the kernel fits every generation's scoped-VMEM
    default (v5e 16 MiB, v6e/v7x 32 MiB) without touching vmem_limit_bytes.
    """
    bytes_per_lane = max((2 * cin + 2 * cout) * itemsize, 1)
    ts = vmem_budget_bytes // bytes_per_lane
    ts = min(ts, max_tile)
    ts = max(128, (ts // 128) * 128)
    if hw <= ts:
        # One full-dim block: always layout-legal (equals the array dim) and
        # within the VMEM budget by construction.
        return hw
    return ts  # multiple of 128 -> legal with cdiv / padded last block


@jax.jit
def out_conv_pallas(x_nchw, weight, bias):
    """1x1 Conv2d forward via Pallas.

    x_nchw: (N, Cin, H, W)        PyTorch NCHW input
    weight: (Cout, Cin, 1, 1)     PyTorch Conv2d weight layout
    bias:   (Cout,)
    returns (N, Cout, H, W)
    """
    N, Cin, H, W = x_nchw.shape
    Cout = weight.shape[0]
    HW = H * W
    itemsize = jnp.dtype(x_nchw.dtype).itemsize

    ts = _pick_spatial_tile(HW, Cin, Cout, itemsize)
    n_spatial = pl.cdiv(HW, ts)
    # v7x has 2 TensorCores: make sure the ("parallel","parallel") grid has at
    # least 2 steps whenever the problem allows, so work can shard across them.
    if N * n_spatial < 2:
        half = _round_up(pl.cdiv(HW, 2), 128)
        if half < HW:
            ts = half
            n_spatial = pl.cdiv(HW, ts)
    grid = (N, n_spatial)

    x2 = x_nchw.reshape(N, Cin, HW)     # free reshape: NCHW is already (C, H*W) per image
    w2 = weight.reshape(Cout, Cin)
    b2 = bias.reshape(Cout, 1)

    out_itemsize = itemsize
    cost = pl.CostEstimate(
        flops=2 * N * HW * Cin * Cout,
        transcendentals=0,
        bytes_accessed=(x2.size * jnp.dtype(x2.dtype).itemsize
                        + w2.size * jnp.dtype(w2.dtype).itemsize
                        + b2.size * jnp.dtype(b2.dtype).itemsize
                        + N * Cout * HW * out_itemsize),
    )

    out = pl.pallas_call(
        outconv_kernel,
        out_shape=jax.ShapeDtypeStruct((N, Cout, HW), x_nchw.dtype),
        grid_spec=pltpu.PrefetchScalarGridSpec(
            num_scalar_prefetch=0,
            grid=grid,
            in_specs=[
                # batch dim squeezed out (None); spatial axis tiled lane-dense.
                # Default double-buffering on x; sweep pl.Buffered(3) only if
                # per-step blocks ever get tiny again.
                pl.BlockSpec((None, Cin, ts), lambda n, s: (n, 0, s)),
                # Grid-invariant operands: single buffer is enough.
                pl.BlockSpec((Cout, Cin), lambda n, s: (0, 0),
                             pipeline_mode=pl.Buffered(1)),
                pl.BlockSpec((Cout, 1), lambda n, s: (0, 0),
                             pipeline_mode=pl.Buffered(1)),
            ],
            out_specs=pl.BlockSpec((None, Cout, ts), lambda n, s: (n, 0, s)),
        ),
        compiler_params=pltpu.CompilerParams(
            dimension_semantics=("parallel", "parallel"),
        ),
        cost_estimate=cost,
    )(x2, w2, b2)
    return out.reshape(N, Cout, H, W)


# ----------------------------- reference / fallback --------------------------
def _ref_out_conv(x_nchw, weight, bias):
    w2 = weight.reshape(weight.shape[0], weight.shape[1])
    y = jnp.einsum("nchw,oc->nohw", x_nchw, w2)
    return y + bias.reshape(1, -1, 1, 1)


def out_conv(x_nchw, weight, bias, *, min_pallas_bytes=1 << 20):
    """Dispatcher: very small problems (launch/step overhead dominated) go to
    fused XLA; everything else goes through the Pallas kernel."""
    out_bytes = (x_nchw.shape[0] * weight.shape[0] * x_nchw.shape[2]
                 * x_nchw.shape[3] * jnp.dtype(x_nchw.dtype).itemsize)
    total_bytes = out_bytes + sum(
        int(a.size) * jnp.dtype(a.dtype).itemsize for a in (x_nchw, weight, bias))
    if total_bytes < min_pallas_bytes:
        return _ref_out_conv(x_nchw, weight, bias).astype(x_nchw.dtype)
    return out_conv_pallas(x_nchw, weight, bias)


# ------------------------------- main ---------------------------------------
if __name__ == "__main__":
    # OutConv(in_channels=4, out_channels=8) on a (2, 4, 16, 16) input.
    N, Cin, H, W = 2, 4, 16, 16
    Cout = 8

    key = jax.random.PRNGKey(0)
    k1, k2, k3 = jax.random.split(key, 3)
    x = jax.random.normal(k1, (N, Cin, H, W), jnp.float32)
    # PyTorch nn.Conv2d(kernel_size=1) parameter shapes.
    weight = 0.1 * jax.random.normal(k2, (Cout, Cin, 1, 1), jnp.float32)
    bias = 0.1 * jax.random.normal(k3, (Cout,), jnp.float32)

    # Exercise the Pallas kernel directly.
    out = jax.block_until_ready(out_conv_pallas(x, weight, bias))
    assert out.shape == (N, Cout, H, W), out.shape

    ref = jax.block_until_ready(_ref_out_conv(x, weight, bias))
    err = float(jnp.max(jnp.abs(out - ref)))
    assert err < 1e-5, err

    # The size-dispatching wrapper must agree as well.
    out2 = jax.block_until_ready(out_conv(x, weight, bias))
    err2 = float(jnp.max(jnp.abs(out2 - ref)))
    assert err2 < 1e-5, err2

    print("KERNEL_OK")
</pallas_src>

<mosaic_0001>
module attributes {stable_mosaic.version = 11 : i64} {
  func.func @outconv_kernel(%arg0: i32, %arg1: i32, %arg2: memref<1x4x256xf32, #tpu.memory_space<vmem>>, %arg3: memref<8x4xf32, #tpu.memory_space<vmem>>, %arg4: memref<8x1xf32, #tpu.memory_space<vmem>>, %arg5: memref<1x8x256xf32, #tpu.memory_space<vmem>>) attributes {dimension_semantics = [#tpu.dimension_semantics<parallel>, #tpu.dimension_semantics<parallel>], iteration_bounds = array<i64: 2, 1>, scalar_prefetch = 0 : i64, scratch_operands = 0 : i64, tpu.core_type = #tpu.core_type<tc>, window_params = [{transform_indices = @transform_0, window_bounds = array<i64: 1, 4, 256>}, {pipeline_mode = #tpu.pipeline_mode<synchronous>, transform_indices = @transform_1, window_bounds = array<i64: 8, 4>}, {pipeline_mode = #tpu.pipeline_mode<synchronous>, transform_indices = @transform_2, window_bounds = array<i64: 8, 1>}, {transform_indices = @transform_3, window_bounds = array<i64: 1, 8, 256>}]} {
    %c0 = arith.constant 0 : index
    %c0_0 = arith.constant 0 : index
    %0 = vector.load %arg3[%c0, %c0_0] : memref<8x4xf32, #tpu.memory_space<vmem>>, vector<8x4xf32>
    %c0_1 = arith.constant 0 : index
    %c0_2 = arith.constant 0 : index
    %c0_3 = arith.constant 0 : index
    %1 = vector.load %arg2[%c0_1, %c0_2, %c0_3] : memref<1x4x256xf32, #tpu.memory_space<vmem>>, vector<1x4x256xf32>
    %2 = vector.shape_cast %1 : vector<1x4x256xf32> to vector<4x256xf32>
    %cst = arith.constant dense<0.000000e+00> : vector<8x256xf32>
    %3 = tpu.matmul %0, %2, %cst {dimension_numbers = #tpu.dot_dimension_numbers<[1], [0], [0], [1], [0, 0, 1, 1], [], []>} : vector<8x4xf32>, vector<4x256xf32>, vector<8x256xf32> -> vector<8x256xf32>
    %c0_4 = arith.constant 0 : index
    %c0_5 = arith.constant 0 : index
    %4 = vector.load %arg4[%c0_4, %c0_5] : memref<8x1xf32, #tpu.memory_space<vmem>>, vector<8x1xf32>
    %5 = vector.broadcast %4 : vector<8x1xf32> to vector<8x256xf32>
    %6 = arith.addf %3, %5 : vector<8x256xf32>
    %c0_6 = arith.constant 0 : index
    %c0_7 = arith.constant 0 : index
    %c0_8 = arith.constant 0 : index
    %7 = vector.load %arg5[%c0_6, %c0_7, %c0_8] : memref<1x8x256xf32, #tpu.memory_space<vmem>>, vector<1x8x256xf32>
    %8 = vector.shape_cast %7 : vector<1x8x256xf32> to vector<8x256xf32>
    %9 = vector.shape_cast %6 : vector<8x256xf32> to vector<1x8x256xf32>
    tpu.vector_store %arg5[%c0_6, %c0_7, %c0_8], %9 {strides = array<i32>} : memref<1x8x256xf32, #tpu.memory_space<vmem>>, vector<1x8x256xf32>,
    return
  }
  func.func @transform_0(%arg0: i32, %arg1: i32) -> (i32, i32, i32) {
    %c0_i32 = arith.constant 0 : i32
    %c0_i32_0 = arith.constant 0 : i32
    return %arg0, %c0_i32, %arg1 : i32, i32, i32
  }
  func.func @transform_1(%arg0: i32, %arg1: i32) -> (i32, i32) {
    %c0_i32 = arith.constant 0 : i32
    %c0_i32_0 = arith.constant 0 : i32
    %c0_i32_1 = arith.constant 0 : i32
    return %c0_i32, %c0_i32_0 : i32, i32
  }
  func.func @transform_2(%arg0: i32, %arg1: i32) -> (i32, i32) {
    %c0_i32 = arith.constant 0 : i32
    %c0_i32_0 = arith.constant 0 : i32
    %c0_i32_1 = arith.constant 0 : i32
    return %c0_i32, %c0_i32_0 : i32, i32
  }
  func.func @transform_3(%arg0: i32, %arg1: i32) -> (i32, i32, i32) {
    %c0_i32 = arith.constant 0 : i32
    %c0_i32_0 = arith.constant 0 : i32
    return %arg0, %c0_i32, %arg1 : i32, i32, i32
  }
}

</mosaic_0001>

<bundles_post_ra>
// kernel: out_conv_pallas.1
= control target key start
LH: loop header
LB: loop body
LE: loop exit
PB: predicated region body
PF: predicated region fallthrough
CT: control target
= control target key end

     0   :  { %s479_s12 = smov 0   ;;  %s481_s13 = smov 0   ;;  %s518_s0 = inlined_call_operand.vmem [shape: f32[2,4,256], index: 0, kind: input, shape index: {}]   ;;  %s519_s1 = inlined_call_operand.vmem [shape: f32[8,4], index: 1, kind: input, shape index: {}]   ;;  %s520_s2 = inlined_call_operand.vmem [shape: f32[8,1], index: 2, kind: input, shape index: {}]   ;;  %s521_s3 = inlined_call_operand.vmem [shape: f32[2,8,256], index: 3, kind: output, shape index: {}]  }
   0x1   :  { %s483_s14 = smov 0  }
   0x2 LB: > { %s25_s15 = sadd.s32 1, %s451_s13  ;;  %p393_p0 = scmp.ge.s32.totalorder %s455_s14, 1  ;;  %s455_s14 = sphi %s483_s14, %s13_s14   ;;  %s451_s13 = sphi %s481_s13, %s523_s13   ;;  %s447_s12 = sphi %s479_s12, %s522_s12  }
   0x3   : > { %p27_p1 = scmp.ge.s32.totalorder %s25_s15, 2  ;;  %p158_p2 = scmp.lt.s32.totalorder %s455_s14, 3 }
   0x5   : > { %s525_s15 = smov (%p27_p1, %s25_s15), 0  ;;  %p159_p3 = pnand %p393_p0, %p158_p2 }
   0x6   : > { %p191_p4 = scmp.lt.s32.totalorder (!%p159_p3), %s447_s12, 1 }
   0x7   : > { %162 = sbr.rel (%p159_p3) target bundleno = 218 (0xda), region = 32 }
   0xc   : > { %v457_v0 = vmov 0.0   ;;  %v458_v1 = vmov 0   ;;  %v212_v2 = vld [vmem:[%s520_s2] sm:$0xff]  ;;  %s527_s12 = smov (!%p191_p4, %s447_s12), 1  ;;  %vm224_vm0 = vcmask 1043456   ;;  %vm220_vm1 = vcmask 31744  }
   0xd   : > { %293 = vmatprep.mubr.f32.mxu0 %v457_v0  ;;  %431 = vset.pattern.permute.xlu0 %v458_v1  ;;  %s403_s18 = sshll.u32 %s527_s12, 3  ;;  %v210_v5 = vld [vmem:[%s519_s1] sm:$0xff]  ;;  %s404_s24 = sshll.u32 %s527_s12, 4 }
   0xe   : > { %215 = vperm.xlu0 %431, %v212_v2   ;;  %s198_s21 = scalar_lea.vmem %s518_s0, %s403_s18  ;;  %s208_s27 = scalar_lea.vmem %s521_s3, %s404_s24 }
   0xf   : > { %v211_v3 = vld [vmem:[%s198_s21] sm:$0xff] }
  0x10   : > { %v219_v4 = vcombine.high %v211_v3, %v211_v3 }
  0x12   : > { %398 = vmatprep.subr.msk.mxu0 %vm224_vm0, %v219_v4 }
  0x13   : > { %399 = vmatpush1.msk.msra.mxu0 %vm224_vm0, %v211_v3 }
  0x14   : > { %400 = vmatmul.mubr.msk.f32.vlgmr.msra.gmra.mxu0 %vm220_vm1, %v210_v5 }
  0x89   : > { %v216_v6 = vpop.permute.xlu0 %215 }
  0xd4   : > { %v295_v7 = vpop.f32.mrf.mxu0 }
  0xd5   : > { %v296_v8 = vadd.f32 %v295_v7, %v216_v6 }
  0xd6   : > { %v297_v9 = vpop.f32.mrf.mxu0 }
  0xd7   : > { %300 = vst [vmem:[%s208_s27] sm:$0xff] %v296_v8  ;;  %v298_v10 = vadd.f32 %v297_v9, %v216_v6 }
  0xd9   : > { %301 = vst [vmem:[%s208_s27 + $0x8] sm:$0xff] %v298_v10 }
  0xda PF: > { %s13_s14 = sadd.s32 1, %s455_s14   ;;  %s522_s12 = smov %s451_s13 }
  0xdb   : > { %p10_p5 = scmp.ge.s32.totalorder %s13_s14, 4   ;;  %s523_s13 = smov %s525_s15 }
  0xdd   :  { %12 = sbr.rel (!%p10_p5) target bundleno = 2 (0x2), region = 62 }

</bundles_post_ra>
